<compile_context>
chip_gen: v5e
topology: v5e:2x2
jax: 0.10.0
libtpu: 0.0.40
codegen_flags: <defaults>
</compile_context>

<pallas_src>
import jax
import jax.numpy as jnp
from jax.experimental import pallas as pl
from jax.experimental.pallas import tpu as pltpu


def _round_up(n, m):
    return ((n + m - 1) // m) * m


def _num_tensorcores():
    """2 on v7x (two TensorCores per chip), 1 on v5e/v6e; safe fallback of 1."""
    try:
        kind = jax.devices()[0].device_kind.lower()
    except Exception:
        return 1
    return 2 if ("v7" in kind or "tpu7" in kind) else 1


def _choose_batch_tiling(B, batch_tile=None, max_tile=512):
    """Pick (batch tile, padded batch).

    Policy from the perf review:
      * pad B only up to a multiple of 8 sublanes, never a full 128-row tile;
      * v5e/v6e (1 TC): the grid is a serial loop, so use as few, as large,
        steps as possible (each grid step costs ~0.35 us of fixed overhead);
      * v7x (2 TCs): keep >= 2 balanced tiles so the "parallel" batch axis can
        be sharded across both cores.
    """
    b8 = _round_up(B, 8)
    if batch_tile is not None:
        tb = min(_round_up(batch_tile, 8), b8)
    else:
        cores = _num_tensorcores()
        if cores > 1 and b8 >= 16:
            tb = min(_round_up(pl.cdiv(b8, cores), 8), max_tile)
        else:
            tb = min(b8, max_tile)
    return tb, _round_up(b8, tb)


def prepare_params(w1, b1, w2, b2, *, use_bf16=True):
    """One-time (per-model) padding + optional bf16 cast of the parameters.

    Hoisted out of the per-forward path so the forward launches no pad/convert
    XLA ops on the weights.  Feature dims are zero-padded to multiples of 128
    so the output path is lane-dense (no masked vst).

    NOTE: zero-padding is load-bearing for correctness — the padded b1 columns
    are 0 so relu(0) = 0 propagates zeros through the second matmul, and the
    padded output columns are sliced off in the wrapper.  Do not change the
    pad fill value.
    """
    in_f, hid = w1.shape
    out_f = w2.shape[1]
    hid_p = _round_up(hid, 128)
    out_p = _round_up(out_f, 128)
    w_dtype = jnp.bfloat16 if use_bf16 else jnp.float32

    w1_p = jnp.pad(w1, ((0, 0), (0, hid_p - hid))).astype(w_dtype)
    b1_p = jnp.pad(b1.reshape(1, -1), ((0, 0), (0, hid_p - hid))).astype(jnp.float32)
    w2_p = jnp.pad(w2, ((0, hid_p - hid), (0, out_p - out_f))).astype(w_dtype)
    b2_p = jnp.pad(b2.reshape(1, -1), ((0, 0), (0, out_p - out_f))).astype(jnp.float32)
    return w1_p, b1_p, w2_p, b2_p


def qnet_kernel(x_ref, w1_ref, b1_ref, w2_ref, b2_ref, o_ref):
    """Fused MLP tile: relu(x @ W1 + b1) @ W2 + b2 for one batch tile.

    Dot operands are cast to the weight dtype (bf16 fast path on v6e/v7x, or
    f32 for the exact-parity fallback); accumulation is f32 via
    preferred_element_type, and the bias add / ReLU stay in f32 (native VPU on
    all generations).  Biases are (1, N) blocks; the broadcast happens in the
    add — no in-body broadcast helpers (JAX does not CSE broadcast_in_dim).
    """
    x = x_ref[...].astype(w1_ref.dtype)
    h = jnp.dot(x, w1_ref[...], preferred_element_type=jnp.float32) + b1_ref[...]
    h = jnp.maximum(h, 0.0)  # ReLU in f32
    out = jnp.dot(h.astype(w2_ref.dtype), w2_ref[...],
                  preferred_element_type=jnp.float32) + b2_ref[...]
    o_ref[...] = out.astype(o_ref.dtype)


def linear_qnet_forward(x, w1_p, b1_p, w2_p, b2_p, *, out_features, batch_tile=None):
    """x: (B, input_size) f32; *_p: pre-padded params from prepare_params().

    Returns (B, out_features) f32.
    """
    B, in_f = x.shape
    hid_p = w1_p.shape[1]
    out_p = w2_p.shape[1]

    tb, b_p = _choose_batch_tiling(B, batch_tile)
    x_p = x if b_p == B else jnp.pad(x, ((0, b_p - B), (0, 0)))
    grid = (b_p // tb,)

    w_bytes = w1_p.dtype.itemsize
    flops = 2 * b_p * (in_f * hid_p + hid_p * out_p)
    bytes_accessed = (
        b_p * in_f * 4              # x (f32)
        + in_f * hid_p * w_bytes    # w1
        + hid_p * 4                 # b1 (f32)
        + hid_p * out_p * w_bytes   # w2
        + out_p * 4                 # b2 (f32)
        + b_p * out_p * 4           # out (f32)
    )  # computed on padded dims -> advisory only, slightly overstates real work

    # Weights/biases have constant index_maps: DMA'd once, kept VMEM-resident,
    # so single-buffer them (default 2-deep buffering only doubles their VMEM).
    resident = pl.Buffered(1)

    out_padded = pl.pallas_call(
        qnet_kernel,
        out_shape=jax.ShapeDtypeStruct((b_p, out_p), x.dtype),
        grid_spec=pltpu.PrefetchScalarGridSpec(
            num_scalar_prefetch=0,
            grid=grid,
            in_specs=[
                # x streams over the batch at the default 2-deep buffering;
                # the tile is small and contiguous, deeper buffering can't help.
                pl.BlockSpec((tb, in_f), lambda i: (i, 0)),
                pl.BlockSpec((in_f, hid_p), lambda i: (0, 0), pipeline_mode=resident),
                pl.BlockSpec((1, hid_p), lambda i: (0, 0), pipeline_mode=resident),
                pl.BlockSpec((hid_p, out_p), lambda i: (0, 0), pipeline_mode=resident),
                pl.BlockSpec((1, out_p), lambda i: (0, 0), pipeline_mode=resident),
            ],
            out_specs=pl.BlockSpec((tb, out_p), lambda i: (i, 0)),
        ),
        compiler_params=pltpu.CompilerParams(
            # Batch tiles are independent -> "parallel" lets v7x use both TCs.
            dimension_semantics=("parallel",),
            # Explicit VMEM budget; fits comfortably within v7x's 64 MiB VMEM.
            vmem_limit_bytes=32 * 1024 * 1024,
        ),
        cost_estimate=pl.CostEstimate(
            flops=flops, transcendentals=0, bytes_accessed=bytes_accessed),
    )(x_p, w1_p, b1_p, w2_p, b2_p)

    return out_padded[:B, :out_features]


def init_params(key, input_size, hidden_size, output_size):
    """Deterministic init mimicking nn.Linear's uniform(-1/sqrt(fan_in), 1/sqrt(fan_in))."""
    k1, k2, k3, k4 = jax.random.split(key, 4)
    bound1 = 1.0 / jnp.sqrt(float(input_size))
    bound2 = 1.0 / jnp.sqrt(float(hidden_size))
    # Stored as (in, out) — transpose of PyTorch's (out, in) weight layout.
    w1 = jax.random.uniform(k1, (input_size, hidden_size), jnp.float32, -bound1, bound1)
    b1 = jax.random.uniform(k2, (1, hidden_size), jnp.float32, -bound1, bound1)
    w2 = jax.random.uniform(k3, (hidden_size, output_size), jnp.float32, -bound2, bound2)
    b2 = jax.random.uniform(k4, (1, output_size), jnp.float32, -bound2, bound2)
    return w1, b1, w2, b2


# TODO(synk): Linear_QNet.save()/load() are host-side torch checkpoint I/O with no
# Pallas equivalent; only the forward pass is implemented here.


if __name__ == "__main__":
    # Module-consistent shapes; batch=256 so the MXU M dimension is used and the
    # adaptive tiling yields grid=(1,) on v5e/v6e and two balanced tiles on v7x.
    batch, input_size, hidden_size, output_size = 256, 16, 32, 4

    key = jax.random.PRNGKey(0)
    kx, kp = jax.random.split(key)
    x = jax.random.normal(kx, (batch, input_size), jnp.float32)
    w1, b1, w2, b2 = init_params(kp, input_size, hidden_size, output_size)

    fwd = jax.jit(linear_qnet_forward, static_argnames=("out_features", "batch_tile"))
    ref_fn = lambda a: jnp.maximum(a @ w1 + b1, 0.0) @ w2 + b2

    # Default path: bf16 MXU operands, f32 accumulation / bias / ReLU.
    # Param prep is done ONCE here, outside the per-step forward path.
    params_bf16 = prepare_params(w1, b1, w2, b2, use_bf16=True)
    out = jax.block_until_ready(fwd(x, *params_bf16, out_features=output_size))
    ref = ref_fn(x)
    assert out.shape == (batch, output_size)
    assert jnp.allclose(out, ref, atol=5e-2, rtol=5e-2), float(jnp.max(jnp.abs(out - ref)))

    # f32-operand fallback on an awkward batch size (exercises the adaptive
    # multiple-of-8 batch padding).  Tolerance is moderate because XLA's own
    # default f32 matmul precision on TPU is not guaranteed bit-identical.
    x2 = jax.random.normal(kx, (37, input_size), jnp.float32)
    params_f32 = prepare_params(w1, b1, w2, b2, use_bf16=False)
    out2 = jax.block_until_ready(fwd(x2, *params_f32, out_features=output_size))
    ref2 = ref_fn(x2)
    assert out2.shape == (37, output_size)
    assert jnp.allclose(out2, ref2, atol=2e-2, rtol=2e-2), float(jnp.max(jnp.abs(out2 - ref2)))

    print("KERNEL_OK")
</pallas_src>

<mosaic_0001>
module attributes {stable_mosaic.version = 11 : i64} {
  func.func @qnet_kernel(%arg0: i32, %arg1: memref<256x16xf32, #tpu.memory_space<vmem>>, %arg2: memref<16x128xbf16, #tpu.memory_space<vmem>>, %arg3: memref<1x128xf32, #tpu.memory_space<vmem>>, %arg4: memref<128x128xbf16, #tpu.memory_space<vmem>>, %arg5: memref<1x128xf32, #tpu.memory_space<vmem>>, %arg6: memref<256x128xf32, #tpu.memory_space<vmem>>) attributes {dimension_semantics = [#tpu.dimension_semantics<parallel>], iteration_bounds = array<i64: 1>, scalar_prefetch = 0 : i64, scratch_operands = 0 : i64, tpu.core_type = #tpu.core_type<tc>, window_params = [{transform_indices = @transform_0, window_bounds = array<i64: 256, 16>}, {pipeline_mode = #tpu.pipeline_mode<synchronous>, transform_indices = @transform_1, window_bounds = array<i64: 16, 128>}, {pipeline_mode = #tpu.pipeline_mode<synchronous>, transform_indices = @transform_2, window_bounds = array<i64: 1, 128>}, {pipeline_mode = #tpu.pipeline_mode<synchronous>, transform_indices = @transform_3, window_bounds = array<i64: 128, 128>}, {pipeline_mode = #tpu.pipeline_mode<synchronous>, transform_indices = @transform_4, window_bounds = array<i64: 1, 128>}, {transform_indices = @transform_5, window_bounds = array<i64: 256, 128>}]} {
    %c0 = arith.constant 0 : index
    %c0_0 = arith.constant 0 : index
    %0 = vector.load %arg1[%c0, %c0_0] : memref<256x16xf32, #tpu.memory_space<vmem>>, vector<256x16xf32>
    %1 = arith.truncf %0 : vector<256x16xf32> to vector<256x16xbf16>
    %c0_1 = arith.constant 0 : index
    %c0_2 = arith.constant 0 : index
    %2 = vector.load %arg2[%c0_1, %c0_2] : memref<16x128xbf16, #tpu.memory_space<vmem>>, vector<16x128xbf16>
    %cst = arith.constant dense<0.000000e+00> : vector<256x128xf32>
    %3 = tpu.matmul %1, %2, %cst {dimension_numbers = #tpu.dot_dimension_numbers<[1], [0], [0], [1], [0, 0, 1, 1], [], []>} : vector<256x16xbf16>, vector<16x128xbf16>, vector<256x128xf32> -> vector<256x128xf32>
    %c0_3 = arith.constant 0 : index
    %c0_4 = arith.constant 0 : index
    %4 = vector.load %arg3[%c0_3, %c0_4] : memref<1x128xf32, #tpu.memory_space<vmem>>, vector<1x128xf32>
    %5 = vector.broadcast %4 : vector<1x128xf32> to vector<256x128xf32>
    %6 = arith.addf %3, %5 : vector<256x128xf32>
    %cst_5 = arith.constant 0.000000e+00 : f32
    %7 = vector.broadcast %cst_5 : f32 to vector<256x128xf32>
    %8 = arith.maximumf %6, %7 : vector<256x128xf32>
    %9 = arith.truncf %8 : vector<256x128xf32> to vector<256x128xbf16>
    %c0_6 = arith.constant 0 : index
    %c0_7 = arith.constant 0 : index
    %10 = vector.load %arg4[%c0_6, %c0_7] : memref<128x128xbf16, #tpu.memory_space<vmem>>, vector<128x128xbf16>
    %cst_8 = arith.constant dense<0.000000e+00> : vector<256x128xf32>
    %11 = tpu.matmul %9, %10, %cst_8 {dimension_numbers = #tpu.dot_dimension_numbers<[1], [0], [0], [1], [0, 0, 1, 1], [], []>} : vector<256x128xbf16>, vector<128x128xbf16>, vector<256x128xf32> -> vector<256x128xf32>
    %c0_9 = arith.constant 0 : index
    %c0_10 = arith.constant 0 : index
    %12 = vector.load %arg5[%c0_9, %c0_10] : memref<1x128xf32, #tpu.memory_space<vmem>>, vector<1x128xf32>
    %13 = vector.broadcast %12 : vector<1x128xf32> to vector<256x128xf32>
    %14 = arith.addf %11, %13 : vector<256x128xf32>
    %c0_11 = arith.constant 0 : index
    %c0_12 = arith.constant 0 : index
    %15 = vector.load %arg6[%c0_11, %c0_12] : memref<256x128xf32, #tpu.memory_space<vmem>>, vector<256x128xf32>
    tpu.vector_store %arg6[%c0_11, %c0_12], %14 {strides = array<i32>} : memref<256x128xf32, #tpu.memory_space<vmem>>, vector<256x128xf32>,
    return
  }
  func.func @transform_0(%arg0: i32) -> (i32, i32) {
    %c0_i32 = arith.constant 0 : i32
    %c0_i32_0 = arith.constant 0 : i32
    return %arg0, %c0_i32 : i32, i32
  }
  func.func @transform_1(%arg0: i32) -> (i32, i32) {
    %c0_i32 = arith.constant 0 : i32
    %c0_i32_0 = arith.constant 0 : i32
    %c0_i32_1 = arith.constant 0 : i32
    return %c0_i32, %c0_i32_0 : i32, i32
  }
  func.func @transform_2(%arg0: i32) -> (i32, i32) {
    %c0_i32 = arith.constant 0 : i32
    %c0_i32_0 = arith.constant 0 : i32
    %c0_i32_1 = arith.constant 0 : i32
    return %c0_i32, %c0_i32_0 : i32, i32
  }
  func.func @transform_3(%arg0: i32) -> (i32, i32) {
    %c0_i32 = arith.constant 0 : i32
    %c0_i32_0 = arith.constant 0 : i32
    %c0_i32_1 = arith.constant 0 : i32
    return %c0_i32, %c0_i32_0 : i32, i32
  }
  func.func @transform_4(%arg0: i32) -> (i32, i32) {
    %c0_i32 = arith.constant 0 : i32
    %c0_i32_0 = arith.constant 0 : i32
    %c0_i32_1 = arith.constant 0 : i32
    return %c0_i32, %c0_i32_0 : i32, i32
  }
  func.func @transform_5(%arg0: i32) -> (i32, i32) {
    %c0_i32 = arith.constant 0 : i32
    %c0_i32_0 = arith.constant 0 : i32
    return %arg0, %c0_i32 : i32, i32
  }
}

</mosaic_0001>

<bundles_post_ra>
// kernel: linear_qnet_forward.1
= control target key start
LH: loop header
LB: loop body
LE: loop exit
PB: predicated region body
PF: predicated region fallthrough
CT: control target
= control target key end

     0   :  { %vm81_vm0 = vcmask 130048   ;;  %s871_s1 = inlined_call_operand.vmem [shape: bf16[16,128], index: 1, kind: input, shape index: {}]   ;;  %s872_s0 = inlined_call_operand.vmem [shape: f32[256,16], index: 0, kind: input, shape index: {}]   ;;  %s873_s2 = inlined_call_operand.vmem [shape: f32[1,128], index: 2, kind: input, shape index: {}]   ;;  %s874_s3 = inlined_call_operand.vmem [shape: bf16[128,128], index: 3, kind: input, shape index: {}]   ;;  %s875_s4 = inlined_call_operand.vmem [shape: f32[1,128], index: 4, kind: input, shape index: {}]   ;;  %s876_s5 = inlined_call_operand.vmem [shape: f32[256,128], index: 5, kind: output, shape index: {}]  }
   0x1   :  { %v512_v0 = vld [vmem:[%s871_s1] sm:$0xff]  ;;  %v22_v2 = vld [vmem:[%s872_s0 + $0x8] sm:$0xff]  ;;  %v23_v4 = vld [vmem:[%s872_s0 + $0x10] sm:$0xff] }
   0x2   :  { %v21_v1 = vld [vmem:[%s872_s0] sm:$0xff]  ;;  %137 = vmatpush.bf16.msra.mxu0 %v512_v0  ;;  %521 = vmatpush.bf16.msra.mxu3 %v512_v0  ;;  %v24_v5 = vld [vmem:[%s872_s0 + $0x18] sm:$0xff]  ;;  %v26_v8 = vld [vmem:[%s872_s0 + $0x28] sm:$0xff] }
   0x3   :  { %v53_v3 = vpack.c.bf16 %v22_v2, %v21_v1  ;;  %v54_v6 = vpack.c.bf16 %v24_v5, %v23_v4  ;;  %v25_v7 = vld [vmem:[%s872_s0 + $0x20] sm:$0xff]  ;;  %v27_v10 = vld [vmem:[%s872_s0 + $0x30] sm:$0xff]  ;;  %v28_v11 = vld [vmem:[%s872_s0 + $0x38] sm:$0xff] }
   0x4   :  { %v55_v9 = vpack.c.bf16 %v26_v8, %v25_v7  ;;  %v56_v12 = vpack.c.bf16 %v28_v11, %v27_v10  ;;  %v29_v13 = vld [vmem:[%s872_s0 + $0x40] sm:$0xff]  ;;  %v30_v14 = vld [vmem:[%s872_s0 + $0x48] sm:$0xff]  ;;  %v520_v16 = vld [vmem:[%s874_s3 + $0x38] sm:$0xff] }
   0x5   :  { %464 = vmatmul.msk.bf16.vlgmr.msra.gmra.mxu0 %vm81_vm0, %v53_v3  ;;  %v57_v15 = vpack.c.bf16 %v30_v14, %v29_v13  ;;  %335 = vmatpush.bf16.msra.mxu1 %v520_v16  ;;  %v31_v17 = vld [vmem:[%s872_s0 + $0x50] sm:$0xff]  ;;  %v32_v18 = vld [vmem:[%s872_s0 + $0x58] sm:$0xff]  ;;  %v518_v21 = vld [vmem:[%s874_s3 + $0x28] sm:$0xff] }
   0x6   :  { %522 = vmatpush.bf16.msra.mxu2 %v520_v16  ;;  %v58_v19 = vpack.c.bf16 %v32_v18, %v31_v17  ;;  %v519_v20 = vld [vmem:[%s874_s3 + $0x30] sm:$0xff]  ;;  %v517_v22 = vld [vmem:[%s874_s3 + $0x20] sm:$0xff]  ;;  %v34_v24 = vld [vmem:[%s872_s0 + $0x68] sm:$0xff] }
   0x7   :  { %v33_v23 = vld [vmem:[%s872_s0 + $0x60] sm:$0xff]  ;;  %v516_v25 = vld [vmem:[%s874_s3 + $0x18] sm:$0xff]  ;;  %v515_v27 = vld [vmem:[%s874_s3 + $0x10] sm:$0xff] }
   0x8   :  { %v59_v26 = vpack.c.bf16 %v34_v24, %v33_v23  ;;  %v39_v28 = vld [vmem:[%s872_s0 + $0x90] sm:$0xff]  ;;  %v40_v29 = vld [vmem:[%s872_s0 + $0x98] sm:$0xff]  ;;  %v514_v31 = vld [vmem:[%s874_s3 + $0x8] sm:$0xff] }
   0x9   :  { %336 = vmatpush.bf16.msra.mxu1 %v519_v20  ;;  %v62_v30 = vpack.c.bf16 %v40_v29, %v39_v28  ;;  %v513_v32 = vld [vmem:[%s874_s3] sm:$0xff]  ;;  %v35_v33 = vld [vmem:[%s872_s0 + $0x70] sm:$0xff]  ;;  %v36_v34 = vld [vmem:[%s872_s0 + $0x78] sm:$0xff] }
   0xa   :  { %523 = vmatpush.bf16.msra.mxu2 %v519_v20  ;;  %v60_v35 = vpack.c.bf16 %v36_v34, %v35_v33  ;;  %v41_v36 = vld [vmem:[%s872_s0 + $0xa0] sm:$0xff]  ;;  %v42_v37 = vld [vmem:[%s872_s0 + $0xa8] sm:$0xff]  ;;  %v43_v43 = vld [vmem:[%s872_s0 + $0xb0] sm:$0xff] }
   0xb   :  { %473 = vmatmul.msk.bf16.vlgmr.msra.gmra.mxu3 %vm81_vm0, %v62_v30  ;;  %v63_v38 = vpack.c.bf16 %v42_v37, %v41_v36  ;;  %v37_v39 = vld [vmem:[%s872_s0 + $0x80] sm:$0xff]  ;;  %v38_v40 = vld [vmem:[%s872_s0 + $0x88] sm:$0xff]  ;;  %v44_v44 = vld [vmem:[%s872_s0 + $0xb8] sm:$0xff] }
   0xc   :  { %v61_v41 = vpack.c.bf16 %v38_v40, %v37_v39  ;;  %v674_v45 = vld [vmem:[%s873_s2] ss:$0 sm:$0xff]  ;;  %v64_v46 = vpack.c.bf16 %v44_v44, %v43_v43  ;;  %v46_v55 = vld [vmem:[%s872_s0 + $0xc8] sm:$0xff]  ;;  %v47_v0 = vld [vmem:[%s872_s0 + $0xd0] sm:$0xff] }
   0xd   :  { %337 = vmatpush.bf16.msra.mxu1 %v518_v21  ;;  %v45_v54 = vld [vmem:[%s872_s0 + $0xc0] sm:$0xff]  ;;  %v48_v1 = vld [vmem:[%s872_s0 + $0xd8] sm:$0xff]  ;;  %v50_v11 = vld [vmem:[%s872_s0 + $0xe8] sm:$0xff] }
   0xe   :  { %524 = vmatpush.bf16.msra.mxu2 %v518_v21  ;;  %v65_v56 = vpack.c.bf16 %v46_v55, %v45_v54  ;;  %v66_v2 = vpack.c.bf16 %v48_v1, %v47_v0  ;;  %v49_v10 = vld [vmem:[%s872_s0 + $0xe0] sm:$0xff]  ;;  %v51_v20 = vld [vmem:[%s872_s0 + $0xf0] sm:$0xff]  ;;  %v52_v21 = vld [vmem:[%s872_s0 + $0xf8] sm:$0xff] }
  0x11   :  { %338 = vmatpush.bf16.msra.mxu1 %v517_v22 }
  0x12   :  { %525 = vmatpush.bf16.msra.mxu2 %v517_v22  ;;  %v68_v22 = vpack.c.bf16 %v52_v21, %v51_v20 }
  0x15   :  { %465 = vmatmul.msk.bf16.gmra.mxu0 %vm81_vm0, %v54_v6  ;;  %339 = vmatpush.bf16.msra.mxu1 %v516_v25 }
  0x16   :  { %526 = vmatpush.bf16.msra.mxu2 %v516_v25 }
  0x19   :  { %340 = vmatpush.bf16.msra.mxu1 %v515_v27 }
  0x1a   :  { %527 = vmatpush.bf16.msra.mxu2 %v515_v27 }
  0x1b   :  { %474 = vmatmul.msk.bf16.gmra.mxu3 %vm81_vm0, %v63_v38 }
  0x1d   :  { %341 = vmatpush.bf16.msra.mxu1 %v514_v31 }
  0x1e   :  { %528 = vmatpush.bf16.msra.mxu2 %v514_v31 }
  0x21   :  { %342 = vmatpush.bf16.msra.mxu1 %v513_v32 }
  0x22   :  { %529 = vmatpush.bf16.msra.mxu2 %v513_v32 }
  0x25   :  { %466 = vmatmul.msk.bf16.gmra.mxu0 %vm81_vm0, %v55_v9 }
  0x2b   :  { %475 = vmatmul.msk.bf16.gmra.mxu3 %vm81_vm0, %v64_v46 }
  0x35   :  { %467 = vmatmul.msk.bf16.gmra.mxu0 %vm81_vm0, %v56_v12  ;;  %v67_v12 = vpack.c.bf16 %v50_v11, %v49_v10 }
  0x3b   :  { %476 = vmatmul.msk.bf16.gmra.mxu3 %vm81_vm0, %v65_v56 }
  0x45   :  { %468 = vmatmul.msk.bf16.gmra.mxu0 %vm81_vm0, %v57_v15 }
  0x4b   :  { %477 = vmatmul.msk.bf16.gmra.mxu3 %vm81_vm0, %v66_v2 }
  0x55   :  { %469 = vmatmul.msk.bf16.gmra.mxu0 %vm81_vm0, %v58_v19 }
  0x5b   :  { %478 = vmatmul.msk.bf16.gmra.mxu3 %vm81_vm0, %v67_v12 }
  0x65   :  { %470 = vmatmul.msk.bf16.gmra.mxu0 %vm81_vm0, %v59_v26 }
  0x6b   :  { %479 = vmatmul.msk.bf16.gmra.mxu3 %vm81_vm0, %v68_v22 }
  0x75   :  { %471 = vmatmul.msk.bf16.gmra.mxu0 %vm81_vm0, %v60_v35 }
  0x82   :  { %v139_v42 = vpop.f32.mrf.mxu0 }
  0x83   :  { %v140_v47 = vadd.f32 %v674_v45, %v139_v42 }
  0x85   :  { %472 = vmatmul.msk.bf16.gmra.mxu0 %vm81_vm0, %v61_v41  ;;  %v219_v50 = vmax.f32 %v140_v47, 0.0 }
  0x8a   :  { %v141_v48 = vpop.f32.mrf.mxu0 }
  0x8b   :  { %v142_v49 = vadd.f32 %v674_v45, %v141_v48 }
  0x8d   :  { %v220_v51 = vmax.f32 %v142_v49, 0.0 }
  0x8e   :  { %v184_v44 = vpop.f32.mrf.mxu3 }
  0x8f   :  { %v251_v52 = vpack.c.bf16 %v220_v51, %v219_v50  ;;  %v185_v2 = vadd.f32 %v674_v45, %v184_v44 }
  0x91   :  { %343 = vmatmul.bf16.vlgmr.msra.gmra.mxu1 %v251_v52 }
  0x92   :  { %v144_v53 = vpop.f32.mrf.mxu0 }
  0x93   :  { %v145_v57 = vadd.f32 %v674_v45, %v144_v53 }
  0x95   :  { %v221_v60 = vmax.f32 %v145_v57, 0.0 }
  0x96   :  { %v186_v49 = vpop.f32.mrf.mxu3 }
  0x9a   :  { %v146_v58 = vpop.f32.mrf.mxu0 }
  0x9b   :  { %v147_v59 = vadd.f32 %v674_v45, %v146_v58  ;;  %v727_v58 = vld [vmem:[%s875_s4] ss:$0 sm:$0xff] }
  0x9d   :  { %v222_v61 = vmax.f32 %v147_v59, 0.0 }
  0x9e   :  { %v189_v54 = vpop.f32.mrf.mxu3 }
  0x9f   :  { %v252_v62 = vpack.c.bf16 %v222_v61, %v221_v60 }
  0xa1   :  { %348 = vmatmul.bf16.gmra.mxu1 %v252_v62 }
  0xa2   :  { %v149_v63 = vpop.f32.mrf.mxu0 }
  0xa3   :  { %v150_v3 = vadd.f32 %v674_v45, %v149_v63 }
  0xa5   :  { %v223_v6 = vmax.f32 %v150_v3, 0.0  ;;  %v187_v3 = vadd.f32 %v674_v45, %v186_v49 }
  0xa6   :  { %v191_v0 = vpop.f32.mrf.mxu3 }
  0xaa   :  { %v151_v4 = vpop.f32.mrf.mxu0 }
  0xab   :  { %v152_v5 = vadd.f32 %v674_v45, %v151_v4 }
  0xad   :  { %v224_v7 = vmax.f32 %v152_v5, 0.0 }
  0xae   :  { %v194_v5 = vpop.f32.mrf.mxu3 }
  0xaf   :  { %v253_v8 = vpack.c.bf16 %v224_v7, %v223_v6  ;;  %v237_v6 = vmax.f32 %v185_v2, 0.0  ;;  %v238_v7 = vmax.f32 %v187_v3, 0.0 }
  0xb1   :  { %353 = vmatmul.bf16.gmra.mxu1 %v253_v8  ;;  %v260_v10 = vpack.c.bf16 %v238_v7, %v237_v6 }
  0xb2   :  { %v154_v9 = vpop.f32.mrf.mxu0 }
  0xb3   :  { %v155_v13 = vadd.f32 %v674_v45, %v154_v9 }
  0xb5   :  { %v225_v16 = vmax.f32 %v155_v13, 0.0  ;;  %v190_v13 = vadd.f32 %v674_v45, %v189_v54 }
  0xb6   :  { %v196_v11 = vpop.f32.mrf.mxu3 }
  0xba   :  { %v156_v14 = vpop.f32.mrf.mxu0 }
  0xbb   :  { %v157_v15 = vadd.f32 %v674_v45, %v156_v14  ;;  %v192_v14 = vadd.f32 %v674_v45, %v191_v0 }
  0xbd   :  { %v226_v17 = vmax.f32 %v157_v15, 0.0 }
  0xbf   :  { %v254_v18 = vpack.c.bf16 %v226_v17, %v225_v16  ;;  %v239_v16 = vmax.f32 %v190_v13, 0.0  ;;  %v240_v17 = vmax.f32 %v192_v14, 0.0 }
  0xc1   :  { %358 = vmatmul.bf16.gmra.mxu1 %v254_v18  ;;  %v261_v21 = vpack.c.bf16 %v240_v17, %v239_v16 }
  0xc2   :  { %v159_v19 = vpop.f32.mrf.mxu0 }
  0xc3   :  { %v160_v23 = vadd.f32 %v674_v45, %v159_v19  ;;  %v199_v19 = vpop.f32.mrf.mxu3 }
  0xc5   :  { %v227_v26 = vmax.f32 %v160_v23, 0.0  ;;  %v195_v23 = vadd.f32 %v674_v45, %v194_v5 }
  0xca   :  { %v161_v24 = vpop.f32.mrf.mxu0 }
  0xcb   :  { %v162_v25 = vadd.f32 %v674_v45, %v161_v24  ;;  %v197_v24 = vadd.f32 %v674_v45, %v196_v11 }
  0xcd   :  { %v228_v27 = vmax.f32 %v162_v25, 0.0 }
  0xcf   :  { %v255_v28 = vpack.c.bf16 %v228_v27, %v227_v26  ;;  %v201_v26 = vpop.f32.mrf.mxu3  ;;  %v241_v27 = vmax.f32 %v195_v23, 0.0 }
  0xd1   :  { %363 = vmatmul.bf16.gmra.mxu1 %v255_v28  ;;  %v242_v28 = vmax.f32 %v197_v24, 0.0 }
  0xd2   :  { %v164_v29 = vpop.f32.mrf.mxu0 }
  0xd3   :  { %v165_v30 = vadd.f32 %v674_v45, %v164_v29 }
  0xd5   :  { %v229_v33 = vmax.f32 %v165_v30, 0.0 }
  0xda   :  { %v166_v31 = vpop.f32.mrf.mxu0 }
  0xdb   :  { %v167_v32 = vadd.f32 %v674_v45, %v166_v31  ;;  %v262_v31 = vpack.c.bf16 %v242_v28, %v241_v27 }
  0xdd   :  { %v230_v34 = vmax.f32 %v167_v32, 0.0  ;;  %v204_v32 = vpop.f32.mrf.mxu3 }
  0xdf   :  { %v256_v35 = vpack.c.bf16 %v230_v34, %v229_v33  ;;  %v200_v34 = vadd.f32 %v674_v45, %v199_v19 }
  0xe1   :  { %368 = vmatmul.bf16.gmra.mxu1 %v256_v35  ;;  %v202_v35 = vadd.f32 %v674_v45, %v201_v26 }
  0xe2   :  { %v169_v36 = vpop.f32.mrf.mxu0 }
  0xe3   :  { %v170_v37 = vadd.f32 %v674_v45, %v169_v36 }
  0xe5   :  { %v231_v40 = vmax.f32 %v170_v37, 0.0  ;;  %v243_v37 = vmax.f32 %v200_v34, 0.0 }
  0xea   :  { %v171_v38 = vpop.f32.mrf.mxu0 }
  0xeb   :  { %v172_v39 = vadd.f32 %v674_v45, %v171_v38  ;;  %v244_v38 = vmax.f32 %v202_v35, 0.0 }
  0xed   :  { %v232_v41 = vmax.f32 %v172_v39, 0.0  ;;  %v206_v39 = vpop.f32.mrf.mxu3 }
  0xef   :  { %v257_v42 = vpack.c.bf16 %v232_v41, %v231_v40 }
  0xf1   :  { %373 = vmatmul.bf16.gmra.mxu1 %v257_v42  ;;  %v263_v42 = vpack.c.bf16 %v244_v38, %v243_v37 }
  0xf2   :  { %v174_v43 = vpop.f32.mrf.mxu0 }
  0xf3   :  { %v175_v46 = vadd.f32 %v674_v45, %v174_v43 }
  0xf5   :  { %v233_v50 = vmax.f32 %v175_v46, 0.0  ;;  %v209_v44 = vpop.f32.mrf.mxu3  ;;  %v205_v46 = vadd.f32 %v674_v45, %v204_v32 }
  0xf7   :  { %v245_v49 = vmax.f32 %v205_v46, 0.0 }
  0xfa   :  { %v176_v47 = vpop.f32.mrf.mxu0 }
  0xfb   :  { %v177_v48 = vadd.f32 %v674_v45, %v176_v47  ;;  %v207_v47 = vadd.f32 %v674_v45, %v206_v39 }
  0xfd   :  { %v234_v51 = vmax.f32 %v177_v48, 0.0  ;;  %v211_v54 = vpop.f32.mrf.mxu3 }
  0xff   :  { %v258_v52 = vpack.c.bf16 %v234_v51, %v233_v50  ;;  %v246_v50 = vmax.f32 %v207_v47, 0.0 }
 0x101   :  { %378 = vmatmul.bf16.gmra.mxu1 %v258_v52 }
 0x102   :  { %v179_v53 = vpop.f32.mrf.mxu0 }
 0x103   :  { %v180_v55 = vadd.f32 %v674_v45, %v179_v53  ;;  %v264_v53 = vpack.c.bf16 %v246_v50, %v245_v49 }
 0x105   :  { %v235_v59 = vmax.f32 %v180_v55, 0.0 }
 0x10a   :  { %v181_v56 = vpop.f32.mrf.mxu0 }
 0x10b   :  { %v182_v57 = vadd.f32 %v674_v45, %v181_v56  ;;  %v210_v56 = vadd.f32 %v674_v45, %v209_v44 }
 0x10d   :  { %v236_v60 = vmax.f32 %v182_v57, 0.0  ;;  %v212_v57 = vadd.f32 %v674_v45, %v211_v54 }
 0x10e   :  { %v344_v61 = vpop.f32.mrf.mxu1 }
 0x10f   :  { %v345_v62 = vadd.f32 %v727_v58, %v344_v61  ;;  %v259_v63 = vpack.c.bf16 %v236_v60, %v235_v59  ;;  %v214_v60 = vpop.f32.mrf.mxu3  ;;  %v247_v61 = vmax.f32 %v210_v56, 0.0 }
 0x111   :  { %424 = vst [vmem:[%s876_s5] sm:$0xff] %v345_v62  ;;  %383 = vmatmul.bf16.vlgmr.msra.gmra.mxu2 %v259_v63  ;;  %v248_v62 = vmax.f32 %v212_v57, 0.0 }
 0x116   :  { %v346_v1 = vpop.f32.mrf.mxu1 }
 0x117   :  { %v347_v4 = vadd.f32 %v727_v58, %v346_v1  ;;  %v265_v1 = vpack.c.bf16 %v248_v62, %v247_v61  ;;  %v216_v2 = vpop.f32.mrf.mxu3 }
 0x118   :  { %v217_v5 = vadd.f32 %v674_v45, %v216_v2 }
 0x119   :  { %425 = vst [vmem:[%s876_s5 + $0x8] sm:$0xff] %v347_v4  ;;  %v215_v4 = vadd.f32 %v674_v45, %v214_v60 }
 0x11b   :  { %v249_v7 = vmax.f32 %v215_v4, 0.0 }
 0x11e   :  { %v349_v8 = vpop.f32.mrf.mxu1 }
 0x11f   :  { %v350_v9 = vadd.f32 %v727_v58, %v349_v8  ;;  %v250_v8 = vmax.f32 %v217_v5, 0.0 }
 0x121   :  { %426 = vst [vmem:[%s876_s5 + $0x10] sm:$0xff] %v350_v9  ;;  %388 = vmatmul.bf16.gmra.mxu2 %v260_v10  ;;  %v266_v11 = vpack.c.bf16 %v250_v8, %v249_v7 }
 0x126   :  { %v351_v12 = vpop.f32.mrf.mxu1 }
 0x127   :  { %v352_v15 = vadd.f32 %v727_v58, %v351_v12 }
 0x129   :  { %427 = vst [vmem:[%s876_s5 + $0x18] sm:$0xff] %v352_v15 }
 0x12e   :  { %v354_v18 = vpop.f32.mrf.mxu1 }
 0x12f   :  { %v355_v20 = vadd.f32 %v727_v58, %v354_v18 }
 0x131   :  { %428 = vst [vmem:[%s876_s5 + $0x20] sm:$0xff] %v355_v20  ;;  %393 = vmatmul.bf16.gmra.mxu2 %v261_v21 }
 0x136   :  { %v356_v22 = vpop.f32.mrf.mxu1 }
 0x137   :  { %v357_v25 = vadd.f32 %v727_v58, %v356_v22 }
 0x139   :  { %429 = vst [vmem:[%s876_s5 + $0x28] sm:$0xff] %v357_v25 }
 0x13e   :  { %v359_v29 = vpop.f32.mrf.mxu1 }
 0x13f   :  { %v360_v30 = vadd.f32 %v727_v58, %v359_v29 }
 0x141   :  { %430 = vst [vmem:[%s876_s5 + $0x30] sm:$0xff] %v360_v30  ;;  %398 = vmatmul.bf16.gmra.mxu2 %v262_v31 }
 0x146   :  { %v361_v33 = vpop.f32.mrf.mxu1 }
 0x147   :  { %v362_v36 = vadd.f32 %v727_v58, %v361_v33 }
 0x149   :  { %431 = vst [vmem:[%s876_s5 + $0x38] sm:$0xff] %v362_v36 }
 0x14e   :  { %v364_v40 = vpop.f32.mrf.mxu1 }
 0x14f   :  { %v365_v41 = vadd.f32 %v727_v58, %v364_v40 }
 0x151   :  { %432 = vst [vmem:[%s876_s5 + $0x40] sm:$0xff] %v365_v41  ;;  %403 = vmatmul.bf16.gmra.mxu2 %v263_v42 }
 0x156   :  { %v366_v43 = vpop.f32.mrf.mxu1 }
 0x157   :  { %v367_v48 = vadd.f32 %v727_v58, %v366_v43 }
 0x159   :  { %433 = vst [vmem:[%s876_s5 + $0x48] sm:$0xff] %v367_v48 }
 0x15e   :  { %v369_v51 = vpop.f32.mrf.mxu1 }
 0x15f   :  { %v370_v52 = vadd.f32 %v727_v58, %v369_v51 }
 0x161   :  { %434 = vst [vmem:[%s876_s5 + $0x50] sm:$0xff] %v370_v52  ;;  %408 = vmatmul.bf16.gmra.mxu2 %v264_v53 }
 0x166   :  { %v371_v55 = vpop.f32.mrf.mxu1 }
 0x167   :  { %v372_v59 = vadd.f32 %v727_v58, %v371_v55 }
 0x169   :  { %435 = vst [vmem:[%s876_s5 + $0x58] sm:$0xff] %v372_v59 }
 0x16e   :  { %v374_v63 = vpop.f32.mrf.mxu1 }
 0x16f   :  { %v375_v0 = vadd.f32 %v727_v58, %v374_v63 }
 0x171   :  { %436 = vst [vmem:[%s876_s5 + $0x60] sm:$0xff] %v375_v0  ;;  %413 = vmatmul.bf16.gmra.mxu2 %v265_v1 }
 0x176   :  { %v376_v3 = vpop.f32.mrf.mxu1 }
 0x177   :  { %v377_v6 = vadd.f32 %v727_v58, %v376_v3 }
 0x179   :  { %437 = vst [vmem:[%s876_s5 + $0x68] sm:$0xff] %v377_v6 }
 0x17e   :  { %v379_v9 = vpop.f32.mrf.mxu1 }
 0x17f   :  { %v380_v10 = vadd.f32 %v727_v58, %v379_v9 }
 0x181   :  { %438 = vst [vmem:[%s876_s5 + $0x70] sm:$0xff] %v380_v10  ;;  %418 = vmatmul.bf16.gmra.mxu2 %v266_v11 }
 0x186   :  { %v381_v12 = vpop.f32.mrf.mxu1 }
 0x187   :  { %v382_v45 = vadd.f32 %v727_v58, %v381_v12 }
 0x189   :  { %439 = vst [vmem:[%s876_s5 + $0x78] sm:$0xff] %v382_v45 }
 0x194   :  { %v384_v13 = vpop.f32.mrf.mxu2 }
 0x195   :  { %v385_v14 = vadd.f32 %v727_v58, %v384_v13 }
 0x197   :  { %440 = vst [vmem:[%s876_s5 + $0x80] sm:$0xff] %v385_v14 }
 0x19c   :  { %v386_v15 = vpop.f32.mrf.mxu2 }
 0x19d   :  { %v387_v16 = vadd.f32 %v727_v58, %v386_v15 }
 0x19f   :  { %441 = vst [vmem:[%s876_s5 + $0x88] sm:$0xff] %v387_v16 }
 0x1a4   :  { %v389_v17 = vpop.f32.mrf.mxu2 }
 0x1a5   :  { %v390_v18 = vadd.f32 %v727_v58, %v389_v17 }
 0x1a7   :  { %442 = vst [vmem:[%s876_s5 + $0x90] sm:$0xff] %v390_v18 }
 0x1ac   :  { %v391_v19 = vpop.f32.mrf.mxu2 }
 0x1ad   :  { %v392_v20 = vadd.f32 %v727_v58, %v391_v19 }
 0x1af   :  { %443 = vst [vmem:[%s876_s5 + $0x98] sm:$0xff] %v392_v20 }
 0x1b4   :  { %v394_v21 = vpop.f32.mrf.mxu2 }
 0x1b5   :  { %v395_v22 = vadd.f32 %v727_v58, %v394_v21 }
 0x1b7   :  { %444 = vst [vmem:[%s876_s5 + $0xa0] sm:$0xff] %v395_v22 }
 0x1bc   :  { %v396_v23 = vpop.f32.mrf.mxu2 }
 0x1bd   :  { %v397_v24 = vadd.f32 %v727_v58, %v396_v23 }
 0x1bf   :  { %445 = vst [vmem:[%s876_s5 + $0xa8] sm:$0xff] %v397_v24 }
 0x1c4   :  { %v399_v25 = vpop.f32.mrf.mxu2 }
 0x1c5   :  { %v400_v26 = vadd.f32 %v727_v58, %v399_v25 }
 0x1c7   :  { %446 = vst [vmem:[%s876_s5 + $0xb0] sm:$0xff] %v400_v26 }
 0x1cc   :  { %v401_v27 = vpop.f32.mrf.mxu2 }
 0x1cd   :  { %v402_v28 = vadd.f32 %v727_v58, %v401_v27 }
 0x1cf   :  { %447 = vst [vmem:[%s876_s5 + $0xb8] sm:$0xff] %v402_v28 }
 0x1d4   :  { %v404_v29 = vpop.f32.mrf.mxu2 }
 0x1d5   :  { %v405_v30 = vadd.f32 %v727_v58, %v404_v29 }
 0x1d7   :  { %448 = vst [vmem:[%s876_s5 + $0xc0] sm:$0xff] %v405_v30 }
 0x1dc   :  { %v406_v31 = vpop.f32.mrf.mxu2 }
 0x1dd   :  { %v407_v32 = vadd.f32 %v727_v58, %v406_v31 }
 0x1df   :  { %449 = vst [vmem:[%s876_s5 + $0xc8] sm:$0xff] %v407_v32 }
 0x1e4   :  { %v409_v33 = vpop.f32.mrf.mxu2 }
 0x1e5   :  { %v410_v34 = vadd.f32 %v727_v58, %v409_v33 }
 0x1e7   :  { %450 = vst [vmem:[%s876_s5 + $0xd0] sm:$0xff] %v410_v34 }
 0x1ec   :  { %v411_v35 = vpop.f32.mrf.mxu2 }
 0x1ed   :  { %v412_v36 = vadd.f32 %v727_v58, %v411_v35 }
 0x1ef   :  { %451 = vst [vmem:[%s876_s5 + $0xd8] sm:$0xff] %v412_v36 }
 0x1f4   :  { %v414_v37 = vpop.f32.mrf.mxu2 }
 0x1f5   :  { %v415_v38 = vadd.f32 %v727_v58, %v414_v37 }
 0x1f7   :  { %452 = vst [vmem:[%s876_s5 + $0xe0] sm:$0xff] %v415_v38 }
 0x1fc   :  { %v416_v39 = vpop.f32.mrf.mxu2 }
 0x1fd   :  { %v417_v40 = vadd.f32 %v727_v58, %v416_v39 }
 0x1ff   :  { %453 = vst [vmem:[%s876_s5 + $0xe8] sm:$0xff] %v417_v40 }
 0x204   :  { %v419_v41 = vpop.f32.mrf.mxu2 }
 0x205   :  { %v420_v42 = vadd.f32 %v727_v58, %v419_v41 }
 0x207   :  { %454 = vst [vmem:[%s876_s5 + $0xf0] sm:$0xff] %v420_v42 }
 0x20c   :  { %v421_v43 = vpop.f32.mrf.mxu2 }
 0x20d   :  { %v422_v44 = vadd.f32 %v727_v58, %v421_v43 }
 0x20f   :  { %455 = vst [vmem:[%s876_s5 + $0xf8] sm:$0xff] %v422_v44 }

</bundles_post_ra>
